<compile_context>
chip_gen: v6e
topology: v6e:2x2x1
jax: 0.10.0
libtpu: 0.0.40
codegen_flags: <defaults>
</compile_context>

<pallas_src>
import jax
import jax.numpy as jnp
from jax.experimental import pallas as pl
from jax.experimental.pallas import tpu as pltpu

_LANE = 128
_SUBLANE = 8


def _round_up(x, m):
    return (x + m - 1) // m * m


def _vmem_capacity_bytes():
    """Per-core VMEM capacity, with a conservative (v7x-sized) fallback."""
    try:
        return int(pltpu.get_tpu_info().vmem_capacity_bytes)
    except Exception:  # older jax / query unavailable -> assume smallest (v7x)
        return 64 * 1024 * 1024


def _choose_tiles(N, C, HW, elt, max_tile_bytes):
    """Pick (batch tile Nb, spatial tile Thw) for the streaming max."""
    # --- batch tile ---------------------------------------------------------
    if N <= _SUBLANE:
        Nb = N                              # block == full dim (no /8 needed)
    else:
        Nb = min(_round_up(N, _SUBLANE), 128)
        if Nb >= N:
            # A single batch block leaves one v7x TensorCore idle: halve it
            # (rounded up to a sublane multiple) so the "parallel" batch axis
            # has >= 2 grid steps.
            half = _round_up((N + 1) // 2, _SUBLANE)
            if half < N:
                Nb = half
        # Never let a minimum-width (128-lane) spatial tile exceed the budget;
        # shrink Nb instead of the lane floor (VMEM safety, esp. v7x 64 MiB).
        if Nb * C * _LANE * elt > max_tile_bytes:
            Nb = max(_SUBLANE,
                     (max_tile_bytes // (C * _LANE * elt)) // _SUBLANE * _SUBLANE)

    # --- spatial tile -------------------------------------------------------
    row_bytes = Nb * C * elt
    Thw = HW                                 # one tile covers all of H*W if it fits
    if HW * row_bytes > max_tile_bytes:
        cand = max(_LANE, (max_tile_bytes // row_bytes) // _LANE * _LANE)
        if cand < HW:
            Thw = cand                       # multiple of 128; last tile is masked
    return Nb, Thw


def _make_cab_kernel(hw, thw, mask_tail):
    def kernel(x_ref, w1t_ref, w2t_ref, o_ref, acc_ref):
        # x_ref:   (Nb, C, Thw)  one spatial tile of Nb batch samples
        # w1t_ref: (C, C4)       fc1 weight, transposed
        # w2t_ref: (C4, C)       fc2 weight, transposed
        # o_ref:   (Nb, C)       per-sample channel attention (lane-dense)
        # acc_ref: (Nb, C) f32   running max over spatial tiles
        k = pl.program_id(1)

        @pl.when(k == 0)
        def _():
            acc_ref[...] = jnp.full_like(acc_ref, -jnp.inf)

        x = x_ref[...]
        if mask_tail:
            # Ragged H*W tail: columns beyond HW contain garbage (no host pad);
            # force them to -inf so the running max is unaffected.
            col = jax.lax.broadcasted_iota(jnp.int32, x.shape, 2)
            rem = hw - k * thw
            x = jnp.where(col < rem, x, jnp.asarray(-jnp.inf, dtype=x.dtype))

        tile_max = jnp.max(x, axis=-1).astype(jnp.float32)        # (Nb, C)
        acc_ref[...] = jnp.maximum(acc_ref[...], tile_max)

        @pl.when(k == pl.num_programs(1) - 1)
        def _():
            pooled = acc_ref[...]                                  # (Nb, C)
            h = jnp.dot(pooled, w1t_ref[...],
                        preferred_element_type=jnp.float32)        # fc1
            h = jnp.maximum(h, 0.0)                                # ReLU
            out = jnp.dot(h, w2t_ref[...],
                          preferred_element_type=jnp.float32)      # fc2
            o_ref[...] = jax.nn.sigmoid(out).astype(o_ref.dtype)   # Sigmoid

    return kernel


def cab_forward(x, w1, w2, *, max_tile_bytes=None):
    """x: (N, C, H, W) NCHW; w1: (C//4, C, 1, 1); w2: (C, C//4, 1, 1)."""
    N, C, H, W = x.shape
    C4 = w1.shape[0]
    HW = H * W
    elt = jnp.dtype(x.dtype).itemsize

    vmem_cap = _vmem_capacity_bytes()
    if max_tile_bytes is None:
        # ~cap/5 per streamed x tile (double-buffered by the pipeline):
        # ~12 MiB on v7x (64 MiB VMEM), 24 MiB on v5e/v6e (128 MiB VMEM).
        max_tile_bytes = min(24 << 20, max(8 << 20, vmem_cap // 5))

    Nb, Thw = _choose_tiles(N, C, HW, elt, max_tile_bytes)
    n_blocks = pl.cdiv(N, Nb)
    k_blocks = pl.cdiv(HW, Thw)
    mask_tail = (HW % Thw) != 0

    x_flat = x.reshape(N, C, HW)
    w1t = w1.reshape(C4, C).T.astype(jnp.float32)   # (C, C4)
    w2t = w2.reshape(C, C4).T.astype(jnp.float32)   # (C4, C)

    # VMEM budget: double-buffered x tile + (double-buffered) weights + acc +
    # output block + slack, clamped to stay under physical VMEM.
    tile_bytes = Nb * C * Thw * elt
    w_bytes = (w1t.size + w2t.size) * 4
    vmem_need = 2 * tile_bytes + 2 * w_bytes + Nb * C * (4 + 2 * elt) + (4 << 20)
    vmem_limit = min(max(vmem_need, 32 << 20), max(vmem_cap - (8 << 20), 32 << 20))

    # Advisory: this call is almost entirely the (exact, unpadded) HBM read of x.
    cost = pl.CostEstimate(
        flops=2 * N * (C * C4 + C4 * C),
        transcendentals=N * C,
        bytes_accessed=x_flat.size * elt + w_bytes + N * C * elt,
    )

    out = pl.pallas_call(
        _make_cab_kernel(HW, Thw, mask_tail),
        out_shape=jax.ShapeDtypeStruct((N, C), x.dtype),
        grid=(n_blocks, k_blocks),                    # (batch, spatial-reduction)
        in_specs=[
            pl.BlockSpec((Nb, C, Thw), lambda n, k: (n, 0, k)),
            pl.BlockSpec((C, C4), lambda n, k: (0, 0)),
            pl.BlockSpec((C4, C), lambda n, k: (0, 0)),
        ],
        out_specs=pl.BlockSpec((Nb, C), lambda n, k: (n, 0)),
        scratch_shapes=[pltpu.VMEM((Nb, C), jnp.float32)],
        compiler_params=pltpu.CompilerParams(
            dimension_semantics=("parallel", "arbitrary"),
            vmem_limit_bytes=int(vmem_limit)),
        cost_estimate=cost,
    )(x_flat, w1t, w2t)

    return out.reshape(N, C, 1, 1)


def cab_reference(x, w1, w2):
    """Pure-JAX reference with identical semantics to the PyTorch module."""
    N, C, H, W = x.shape
    C4 = w1.shape[0]
    pooled = jnp.max(x.reshape(N, C, H * W), axis=-1)        # (N, C)
    h = jnp.maximum(pooled @ w1.reshape(C4, C).T, 0.0)       # (N, C4)
    out = jax.nn.sigmoid(h @ w2.reshape(C, C4).T)            # (N, C)
    return out.reshape(N, C, 1, 1)


if __name__ == "__main__":
    # Test 1: small shapes, single tile, single batch block.
    N, C, H, W = 2, 16, 16, 16
    key = jax.random.PRNGKey(0)
    kx, k1, k2 = jax.random.split(key, 3)

    x = jax.random.normal(kx, (N, C, H, W), dtype=jnp.float32)
    w1 = jax.random.normal(k1, (C // 4, C, 1, 1), dtype=jnp.float32) * 0.25
    w2 = jax.random.normal(k2, (C, C // 4, 1, 1), dtype=jnp.float32) * 0.25

    y = cab_forward(x, w1, w2)
    jax.block_until_ready(y)
    assert y.shape == (N, C, 1, 1)
    assert jnp.allclose(y, cab_reference(x, w1, w2), atol=1e-5, rtol=1e-5)

    # Test 2: ragged batch (12 with Nb=8 -> 2 parallel batch blocks), single
    # spatial tile (default budget).
    N2, C2, H2, W2 = 12, 32, 60, 50
    kx2, k3, k4 = jax.random.split(jax.random.PRNGKey(1), 3)
    x2 = jax.random.normal(kx2, (N2, C2, H2, W2), dtype=jnp.float32)
    w1b = jax.random.normal(k3, (C2 // 4, C2, 1, 1), dtype=jnp.float32) * 0.1
    w2b = jax.random.normal(k4, (C2, C2 // 4, 1, 1), dtype=jnp.float32) * 0.1
    y2 = cab_forward(x2, w1b, w2b)
    jax.block_until_ready(y2)
    assert jnp.allclose(y2, cab_reference(x2, w1b, w2b), atol=1e-5, rtol=1e-5)

    # Test 3: same data with a tiny tile budget to force spatial tiling, the
    # pl.when running-max accumulator, and in-kernel ragged-tail masking
    # (HW = 3000 is not a multiple of the 128-lane tile).
    y3 = cab_forward(x2, w1b, w2b, max_tile_bytes=64 * 1024)
    jax.block_until_ready(y3)
    assert jnp.allclose(y3, cab_reference(x2, w1b, w2b), atol=1e-5, rtol=1e-5)

    print("KERNEL_OK")
</pallas_src>

<mosaic_0001>
module attributes {stable_mosaic.version = 11 : i64} {
  func.func @kernel(%arg0: i32, %arg1: i32, %arg2: memref<2x16x256xf32, #tpu.memory_space<vmem>>, %arg3: memref<16x4xf32, #tpu.memory_space<vmem>>, %arg4: memref<4x16xf32, #tpu.memory_space<vmem>>, %arg5: memref<2x16xf32, #tpu.memory_space<vmem>>, %arg6: memref<2x16xf32, #tpu.memory_space<vmem>>) attributes {dimension_semantics = [#tpu.dimension_semantics<parallel>, #tpu.dimension_semantics<arbitrary>], iteration_bounds = array<i64: 1, 1>, scalar_prefetch = 0 : i64, scratch_operands = 1 : i64, tpu.core_type = #tpu.core_type<tc>, window_params = [{transform_indices = @transform_0, window_bounds = array<i64: 2, 16, 256>}, {pipeline_mode = #tpu.pipeline_mode<synchronous>, transform_indices = @transform_1, window_bounds = array<i64: 16, 4>}, {pipeline_mode = #tpu.pipeline_mode<synchronous>, transform_indices = @transform_2, window_bounds = array<i64: 4, 16>}, {transform_indices = @transform_3, window_bounds = array<i64: 2, 16>}]} {
    %c0_i32 = arith.constant 0 : i32
    %0 = arith.cmpi eq, %arg1, %c0_i32 : i32
    %1 = arith.extui %0 : i1 to i32
    %c0_i32_0 = arith.constant 0 : i32
    %2 = arith.cmpi ne, %1, %c0_i32_0 : i32
    scf.if %2 {
      %cst_9 = arith.constant 0xFF800000 : f32
      %11 = vector.broadcast %cst_9 : f32 to vector<2x16xf32>
      %c0_10 = arith.constant 0 : index
      %c0_11 = arith.constant 0 : index
      %12 = vector.load %arg6[%c0_10, %c0_11] : memref<2x16xf32, #tpu.memory_space<vmem>>, vector<2x16xf32>
      tpu.vector_store %arg6[%c0_10, %c0_11], %11 {strides = array<i32>} : memref<2x16xf32, #tpu.memory_space<vmem>>, vector<2x16xf32>,
    } else {
    }
    %c0 = arith.constant 0 : index
    %c0_1 = arith.constant 0 : index
    %c0_2 = arith.constant 0 : index
    %3 = vector.load %arg2[%c0, %c0_1, %c0_2] : memref<2x16x256xf32, #tpu.memory_space<vmem>>, vector<2x16x256xf32>
    %cst = arith.constant dense<0xFF800000> : vector<2x16xf32>
    %4 = vector.multi_reduction <maximumf>, %3, %cst [2] : vector<2x16x256xf32> to vector<2x16xf32>
    %c0_3 = arith.constant 0 : index
    %c0_4 = arith.constant 0 : index
    %5 = vector.load %arg6[%c0_3, %c0_4] : memref<2x16xf32, #tpu.memory_space<vmem>>, vector<2x16xf32>
    %6 = arith.maximumf %5, %4 : vector<2x16xf32>
    %c0_5 = arith.constant 0 : index
    %c0_6 = arith.constant 0 : index
    %7 = vector.load %arg6[%c0_5, %c0_6] : memref<2x16xf32, #tpu.memory_space<vmem>>, vector<2x16xf32>
    tpu.vector_store %arg6[%c0_5, %c0_6], %6 {strides = array<i32>} : memref<2x16xf32, #tpu.memory_space<vmem>>, vector<2x16xf32>,
    %c0_i32_7 = arith.constant 0 : i32
    %8 = arith.cmpi eq, %arg1, %c0_i32_7 : i32
    %9 = arith.extui %8 : i1 to i32
    %c0_i32_8 = arith.constant 0 : i32
    %10 = arith.cmpi ne, %9, %c0_i32_8 : i32
    scf.if %10 {
      %c0_9 = arith.constant 0 : index
      %c0_10 = arith.constant 0 : index
      %11 = vector.load %arg6[%c0_9, %c0_10] : memref<2x16xf32, #tpu.memory_space<vmem>>, vector<2x16xf32>
      %c0_11 = arith.constant 0 : index
      %c0_12 = arith.constant 0 : index
      %12 = vector.load %arg3[%c0_11, %c0_12] : memref<16x4xf32, #tpu.memory_space<vmem>>, vector<16x4xf32>
      %cst_13 = arith.constant dense<0.000000e+00> : vector<2x4xf32>
      %13 = tpu.matmul %11, %12, %cst_13 {dimension_numbers = #tpu.dot_dimension_numbers<[1], [0], [0], [1], [0, 0, 1, 1], [], []>} : vector<2x16xf32>, vector<16x4xf32>, vector<2x4xf32> -> vector<2x4xf32>
      %cst_14 = arith.constant 0.000000e+00 : f32
      %14 = vector.broadcast %cst_14 : f32 to vector<2x4xf32>
      %15 = arith.maximumf %13, %14 : vector<2x4xf32>
      %c0_15 = arith.constant 0 : index
      %c0_16 = arith.constant 0 : index
      %16 = vector.load %arg4[%c0_15, %c0_16] : memref<4x16xf32, #tpu.memory_space<vmem>>, vector<4x16xf32>
      %cst_17 = arith.constant dense<0.000000e+00> : vector<2x16xf32>
      %17 = tpu.matmul %15, %16, %cst_17 {dimension_numbers = #tpu.dot_dimension_numbers<[1], [0], [0], [1], [0, 0, 1, 1], [], []>} : vector<2x4xf32>, vector<4x16xf32>, vector<2x16xf32> -> vector<2x16xf32>
      %18 = arith.negf %17 : vector<2x16xf32>
      %19 = math.exp %18 : vector<2x16xf32>
      %cst_18 = arith.constant 1.000000e+00 : f32
      %20 = vector.broadcast %cst_18 : f32 to vector<2x16xf32>
      %21 = arith.addf %20, %19 : vector<2x16xf32>
      %22 = arith.divf %20, %21 : vector<2x16xf32>
      %c0_19 = arith.constant 0 : index
      %c0_20 = arith.constant 0 : index
      %23 = vector.load %arg5[%c0_19, %c0_20] : memref<2x16xf32, #tpu.memory_space<vmem>>, vector<2x16xf32>
      tpu.vector_store %arg5[%c0_19, %c0_20], %22 {strides = array<i32>} : memref<2x16xf32, #tpu.memory_space<vmem>>, vector<2x16xf32>,
    } else {
    }
    return
  }
  func.func @transform_0(%arg0: i32, %arg1: i32) -> (i32, i32, i32) {
    %c0_i32 = arith.constant 0 : i32
    %c0_i32_0 = arith.constant 0 : i32
    return %arg0, %c0_i32, %arg1 : i32, i32, i32
  }
  func.func @transform_1(%arg0: i32, %arg1: i32) -> (i32, i32) {
    %c0_i32 = arith.constant 0 : i32
    %c0_i32_0 = arith.constant 0 : i32
    %c0_i32_1 = arith.constant 0 : i32
    return %c0_i32, %c0_i32_0 : i32, i32
  }
  func.func @transform_2(%arg0: i32, %arg1: i32) -> (i32, i32) {
    %c0_i32 = arith.constant 0 : i32
    %c0_i32_0 = arith.constant 0 : i32
    %c0_i32_1 = arith.constant 0 : i32
    return %c0_i32, %c0_i32_0 : i32, i32
  }
  func.func @transform_3(%arg0: i32, %arg1: i32) -> (i32, i32) {
    %c0_i32 = arith.constant 0 : i32
    %c0_i32_0 = arith.constant 0 : i32
    return %arg0, %c0_i32 : i32, i32
  }
}

</mosaic_0001>

<bundles_post_ra>
// kernel: tpu_custom_call.1
= control target key start
LH: loop header
LB: loop body
LE: loop exit
PB: predicated region body
PF: predicated region fallthrough
CT: control target
= control target key end

     0   :  { %8 = vsyncpa [#allocation4], 0  ;;  %s391_s0 = inlined_call_operand.hbm [shape: f32[2,16,256], index: 0, kind: input, shape index: {}]   ;;  %s392_s1 = inlined_call_operand.vmem [shape: f32[16,4], index: 1, kind: input, shape index: {}]   ;;  %s393_s2 = inlined_call_operand.vmem [shape: f32[4,16], index: 2, kind: input, shape index: {}]   ;;  %s394_s3 = inlined_call_operand.hbm [shape: f32[2,16], index: 3, kind: output, shape index: {}]  }
   0x1   :  { %9 = vsyncpa [#allocation5], 0  ;;  %s346_s12 = smov [#allocation3]  }
   0x2   :  { %s15_s13 = sshll.u32 %s346_s12, 4  ;;  %s16_s13 = int_to_ptr.vmem [resolvable:$true] %s15_s13 }
   0x3   :  { %s310_s14 = scalar_lea.vmem %s16_s13, 1024  ;;  %p315_p1 = scmp.lt.s32.totalorder %s16_s13, %s16_s13 }
   0x4   :  { %p311_p0 = scmp.ne.s32.totalorder %s16_s13, %s310_s14  ;;  %p316_p2 = scmp.lt.s32.totalorder %s310_s14, %s310_s14 }
   0x6   :  { %p317_p3 = por %p316_p2, %p315_p1 }
   0x8   :  { %p318_p4 = pnand %p317_p3, %p311_p0 }
   0xa   :  { %321 = shalt.err (!%p318_p4)
}
   0xb   :  { %s347_s15 = smov 256   ;;  %s348_s16 = smov 16  }
   0xc   :  { %21 = dma.hbm_to_vmem [thread:$0]  %s391_s0, 1024, %s16_s13, [#allocation4], %s347_s15, %s347_s15, %s348_s16  }
   0xd   :  { %342 = dma.done.wait [#allocation4], 1024  }
   0xe   :  { %343 = vsyncadd [#allocation4], 4294966272  ;;  %v39_v0 = vld [vmem:[#allocation3 + $0x20] sm:$0xff]  ;;  %v40_v1 = vld [vmem:[#allocation3 + $0x28] sm:$0xff]  ;;  %vm33_vm0 = vcmask 123904   ;;  %v349_v12 = vmov -inf   ;;  %v60_v16 = vlaneseq }
   0xf   :  { %v35_v2 = vld [vmem:[#allocation3] sm:$0xff]  ;;  %v49_v3 = vmax.f32 %v39_v0, %v40_v1  ;;  %v36_v4 = vld [vmem:[#allocation3 + $0x8] sm:$0xff]  ;;  %v41_v5 = vld [vmem:[#allocation3 + $0x30] sm:$0xff]  ;;  %34 = vst.msk [vmem:[#allocation2] sm:$0x3] %vm33_vm0, %v349_v12  ;;  %v350_v14 = vmov 0.0  }
  0x10   :  { %v42_v6 = vld [vmem:[#allocation3 + $0x38] sm:$0xff]  ;;  %v43_v7 = vmax.f32 %v35_v2, %v36_v4  ;;  %v37_v8 = vld [vmem:[#allocation3 + $0x10] sm:$0xff]  ;;  %v93_v13 = vld [vmem:[%s392_s1 + $0x8] sm:$0xff]  ;;  %279 = vmatprep.subr.mxu0 %v350_v14  ;;  %vm351_vm1 = vmmov 0   ;;  %286 = vmatprep.subr.mxu1 %v350_v14  ;;  %v61_v17 = vand.u32 127, %v60_v16  ;;  %v63_v18 = vshrl.u32 %v60_v16, 7 }
  0x11   :  { %v38_v9 = vld [vmem:[#allocation3 + $0x18] sm:$0xff]  ;;  %50 = vmax.xlane.f32.xlu1 %v49_v3  ;;  %v52_v10 = vmax.f32 %v41_v5, %v42_v6  ;;  %283 = vmatprep.mubr.msk.f32.mxu0 %vm351_vm1, %v350_v14  ;;  %vm71_vm2 = vcmask 130112   ;;  %vm82_vm3 = vcmask 1041409   ;;  %vm94_vm4 = vcmask 130048   ;;  %s352_s23 = smov [#allocation6]  }
  0x12   :  { %44 = vmax.xlane.f32.xlu0 %v43_v7  ;;  %v46_v11 = vmax.f32 %v37_v8, %v38_v9  ;;  %v92_v15 = vld [vmem:[%s392_s1] sm:$0xff]  ;;  %280 = vmatpush3.msra.mxu0 %v93_v13  ;;  %v66_v19 = vadd.s32 4294967288, %v61_v17  ;;  %v64_v21 = vsub.s32 %v61_v17, %v63_v18  ;;  %vm174_vm5 = vcmask 1043456   ;;  %s261_s24 = sshll.u32 %s352_s23, 4  ;;  %s262_s24 = int_to_ptr.vmem [resolvable:$true] %s261_s24 }
  0x13   :  { %281 = vmatprep.subr.mxu0 %v350_v14  ;;  %288 = vmatprep.mubr.msk.f32.mxu1 %vm351_vm1, %v350_v14  ;;  %v169_v36 = vld [vmem:[%s393_s2] sm:$0xf]  ;;  %vm170_vm6 = vcmask 31744   ;;  %s322_s2 = scalar_lea.vmem %s262_s24, 32  ;;  %p327_p6 = scmp.lt.s32.totalorder %s262_s24, %s262_s24 }
  0x14   :  { %282 = vmatpush3.msra.mxu0 %v92_v15  ;;  %v69_v23 = vsub.s32 %v66_v19, %v63_v18  ;;  %287 = vmatpush3.msk.msra.mxu1 %vm174_vm5, %v169_v36  ;;  %p323_p5 = scmp.ne.s32.totalorder %s262_s24, %s322_s2  ;;  %p328_p7 = scmp.lt.s32.totalorder %s322_s2, %s322_s2 }
  0x15   :  { %53 = vmax.xlane.f32.xlu1 %v52_v10 }
  0x16   :  { %47 = vmax.xlane.f32.xlu0 %v46_v11  ;;  %v55_v31 = vld [vmem:[#allocation2] sm:$0x3]  ;;  %p329_p8 = por %p328_p7, %p327_p6 }
  0x18   :  { %p330_p9 = pnand %p329_p8, %p323_p5 }
  0x9a   :  { %v51_v20 = vpop.xlane.xlu1 %50 }
  0x9b   :  { %v45_v22 = vpop.xlane.xlu0 %44  ;;  %v76_v25 = vrot.slane %v51_v20, %v64_v21 }
  0x9c   :  { %v65_v28 = vrot.slane %v45_v22, %v64_v21 }
  0x9e   :  { %v54_v24 = vpop.xlane.xlu1 %53 }
  0x9f   :  { %v80_v26 = vrot.slane %v54_v24, %v69_v23  ;;  %v48_v27 = vpop.xlane.xlu0 %47 }
  0xa0   :  { %v70_v29 = vrot.slane %v48_v27, %v69_v23 }
  0xa1   :  { %v81_v30 = vsel %vm71_vm2, %v80_v26, %v76_v25 }
  0xa2   :  { %v72_v32 = vsel %vm71_vm2, %v70_v29, %v65_v28 }
  0xa3   :  { %v83_v33 = vsel %vm82_vm3, %v81_v30, %v72_v32 }
  0xa4   :  { %v85_v34 = vmax.f32 %v55_v31, %v83_v33 }
  0xa6   :  { %87 = vst.msk [vmem:[#allocation2] sm:$0x3] %vm33_vm0, %v85_v34 }
  0xad   :  { %v91_v35 = vld [vmem:[#allocation2] sm:$0x3] }
  0xae   :  { %284 = vmatmul.mubr.msk.f32.vlgmr.msra.gmra.mxu0 %vm94_vm4, %v91_v35 }
 0x16e   :  { %v164_v37 = vpop.f32.mrf.mxu0 }
 0x16f   :  { %v168_v38 = vmax.f32 %v164_v37, 0.0 }
 0x170   :  { %v285_v39 = vpop.f32.mrf.mxu0 }
 0x171   :  { %289 = vmatmul.mubr.msk.f32.vlgmr.msra.gmra.mxu1 %vm170_vm6, %v168_v38 }
 0x231   :  { %v244_v40 = vpop.f32.mrf.mxu1 }
 0x232   :  { %v273_v41 = vmul.f32 -1.442695, %v244_v40 }
 0x233   :  { %v290_v42 = vpop.f32.mrf.mxu1 }
 0x234   :  { %298 = vpow2.f32 %v273_v41 }
 0x241   :  { %v299_v43 = vpop.eup %298 }
 0x242   :  { %v251_v44 = vadd.f32 1.0, %v299_v43 }
 0x244   :  { %300 = vrcp.f32 %v251_v44 }
 0x251   :  { %v301_v45 = vpop.eup %300 }
 0x252   :  { %254 = vst.msk [vmem:[#allocation6] sm:$0x3] %vm33_vm0, %v301_v45 }
 0x253   :  { %333 = shalt.err (!%p330_p9)
}
 0x254   :  { %264 = dma.vmem_to_hbm [thread:$0]  %s262_s24, 32, %s394_s3, [#allocation5]  }
 0x255   :  { %344 = dma.done.wait [#allocation5], 32  }
 0x256   :  { %345 = vsyncadd [#allocation5], 4294967264 }
 0x257   :  { %268 = vsyncpa [#allocation4], 1 }
 0x258   :  { %269 = vsyncpa [#allocation5], 1 }

</bundles_post_ra>
